<compile_context>
chip_gen: v7x
topology: tpu7x:2x2x1
jax: 0.10.0
libtpu: 0.0.40
codegen_flags: <defaults>
</compile_context>

<pallas_src>
import functools

import jax
import jax.numpy as jnp
from jax.experimental import pallas as pl
from jax.experimental.pallas import tpu as pltpu


def _round_up(v, m):
    return ((v + m - 1) // m) * m


def _cdiv(a, b):
    return -(-a // b)


# ----------------------------- kernels --------------------------------------


def _linear_bias_kernel(x_ref, w_ref, b_ref, o_ref, acc_ref):
    """One (tm, tn) output tile accumulated over the K grid axis, + bias."""
    k = pl.program_id(2)

    @pl.when(k == 0)
    def _():
        acc_ref[...] = jnp.zeros_like(acc_ref)

    # Canonical MXU contraction: X (tm, tk) @ W (tk, tn), f32 accumulation.
    acc_ref[...] += jnp.dot(x_ref[...], w_ref[...],
                            preferred_element_type=jnp.float32)

    @pl.when(k == pl.num_programs(2) - 1)
    def _():
        o_ref[...] = (acc_ref[...] + b_ref[...]).astype(o_ref.dtype)


def _linear_nobias_kernel(x_ref, w_ref, o_ref, acc_ref):
    """Same as above, without the bias stream/add."""
    k = pl.program_id(2)

    @pl.when(k == 0)
    def _():
        acc_ref[...] = jnp.zeros_like(acc_ref)

    acc_ref[...] += jnp.dot(x_ref[...], w_ref[...],
                            preferred_element_type=jnp.float32)

    @pl.when(k == pl.num_programs(2) - 1)
    def _():
        o_ref[...] = acc_ref[...].astype(o_ref.dtype)


# --------------------------- chip profile / tiling ---------------------------


def _chip_profile():
    """Per-generation TensorCore count, VMEM limit and tile caps."""
    kind = ""
    try:
        kind = jax.devices()[0].device_kind.lower()
    except Exception:
        pass
    if "v7" in kind:
        # 2 TensorCores per chip, 64 MiB VMEM per TC: stay well under the
        # per-TC capacity; 512x1024 output tiles clear the ~310 flops/byte ridge.
        return dict(num_tc=2, vmem_limit=48 << 20,
                    tm_cap=512, tn_cap=1024, tk_cap=1024)
    if ("v4" in kind) or ("v5p" in kind):
        # Megacore chips: 2 TCs, 128 MiB VMEM.
        return dict(num_tc=2, vmem_limit=96 << 20,
                    tm_cap=1024, tn_cap=2048, tk_cap=1024)
    # v5e / v6e: single TensorCore, 128 MiB VMEM. 1024x2048 output tiles give
    # ~683 flops/byte, above the HBM ridge on both generations.
    return dict(num_tc=1, vmem_limit=96 << 20,
                tm_cap=1024, tn_cap=2048, tk_cap=1024)


def _pick_tile(dim, cap, floor):
    """Largest multiple of 128 <= cap dividing round_up(dim,128) (>= floor);
    else fall back to the cap (padding the dim up to a multiple of it)."""
    d128 = _round_up(dim, 128)
    if d128 <= cap:
        return d128
    t = (cap // 128) * 128
    while t >= floor:
        if d128 % t == 0:
            return t
        t -= 128
    return (cap // 128) * 128


def _choose_col_tiles(N, K, prof, *, x_bytes, w_bytes, o_bytes):
    """Pick (tm_cap, tn, tk) for this layer.

    tn / tk depend only on (N, K) and the chip, so they are fixed at layer
    construction (this lets the weight be cast / transposed / padded exactly
    once).  tm_cap is the worst-case row tile; the per-call tm is <= tm_cap,
    so the VMEM budget checked here is an upper bound for every call.
    """
    budget = (prof["vmem_limit"] * 3) // 4
    tm = prof["tm_cap"]
    tn = _pick_tile(N, prof["tn_cap"], floor=512)
    tk = _pick_tile(K, prof["tk_cap"], floor=512)

    def usage(tm_, tn_, tk_):
        return (2 * (tm_ * tk_ * x_bytes + tk_ * tn_ * w_bytes)  # 2x-buffered inputs
                + tm_ * tn_ * 4                                  # f32 accumulator
                + 2 * tm_ * tn_ * o_bytes                        # 2x-buffered output
                + 2 * tn_ * 4)                                   # bias row

    # Shrink order (per review): tk first (does not reduce HBM reuse), then
    # tn, then tm; keep everything MXU-/layout-friendly as long as possible.
    while usage(tm, tn, tk) > budget:
        if tk > 256:
            tk = max(256, (tk // 2) // 128 * 128)
        elif tn > 256:
            tn = max(256, (tn // 2) // 128 * 128)
        elif tm > 256:
            tm = max(256, (tm // 2) // 16 * 16)
        elif tn > 128:
            tn = 128
        elif tm > 16:
            tm = max(16, (tm // 2) // 16 * 16)
        else:
            break
    return tm, tn, tk


def _choose_tm(M, tm_cap, num_tc, n_col_tiles):
    """Per-call row tile: as large as possible, preferring candidates that
    minimize M padding; split along M only on dual-TensorCore chips."""
    m16 = _round_up(max(M, 1), 16)
    if m16 <= tm_cap:
        tm = m16
    else:
        cands = sorted({tm_cap,
                        max(256, ((tm_cap // 2) // 16) * 16),
                        max(256, ((tm_cap // 4) // 16) * 16)}, reverse=True)
        tm = cands[0]
        best_pad = _round_up(M, tm) - M
        for c in cands[1:]:
            pad = _round_up(M, c) - M
            if pad < best_pad:
                tm, best_pad = c, pad
    # Dual-TensorCore (v4/v5p megacore, v7x): expose >= 2 parallel output tiles
    # by splitting along M, never below a 256-row tile. Skipped on 1-TC chips
    # (v5e/v6e), where shrinking would only reduce HBM reuse.
    if num_tc >= 2:
        n_tiles = _cdiv(M, tm) * n_col_tiles
        if n_tiles < 2 and tm >= 512:
            tm = max(256, ((tm // 2) // 16) * 16)
    return tm


# ----------------------------- pallas wrapper --------------------------------


@functools.partial(
    jax.jit,
    static_argnames=("tm", "tn", "tk", "n_out", "add_bias", "vmem_limit_bytes"))
def _column_linear_2d(x2d, w_kn, b_row, *, tm, tn, tk, n_out, add_bias,
                      vmem_limit_bytes):
    """x2d: [M, K]; w_kn: [Kp, Np] bf16 pre-padded; b_row: [1, Np] f32 or None.

    Returns [M, n_out] in x2d.dtype. f32 inputs are rounded to bf16 for the MXU
    operand stream (f32 accumulation in VMEM) — the TPU fast path, a numerics
    change vs. a full-f32 matmul.
    """
    M, K = x2d.shape
    Kp, Np = w_kn.shape
    out_dtype = x2d.dtype
    o_bytes = jnp.dtype(out_dtype).itemsize

    x_c = x2d.astype(jnp.bfloat16) if x2d.dtype == jnp.float32 else x2d

    # Pad only when needed (zeros contribute nothing to the contraction).
    Mp = _round_up(M, tm)
    if (Mp, Kp) != (M, K):
        x_c = jnp.pad(x_c, ((0, Mp - M), (0, Kp - K)))

    assert Kp % tk == 0 and Np % tn == 0 and Mp % tm == 0
    grid = (Mp // tm, Np // tn, Kp // tk)

    x_spec = pl.BlockSpec((tm, tk), lambda i, j, k: (i, k))
    w_spec = pl.BlockSpec((tk, tn), lambda i, j, k: (k, j))
    o_spec = pl.BlockSpec((tm, tn), lambda i, j, k: (i, j))

    # Actual streaming traffic: X re-read once per output-column panel, W once
    # per output-row panel, output written once.
    cost = pl.CostEstimate(
        flops=2 * Mp * Np * Kp,
        bytes_accessed=(Mp * Kp * x_c.dtype.itemsize * (Np // tn)
                        + Kp * Np * w_kn.dtype.itemsize * (Mp // tm)
                        + Mp * Np * o_bytes),
        transcendentals=0,
    )
    params = pltpu.CompilerParams(
        dimension_semantics=("parallel", "parallel", "arbitrary"),
        vmem_limit_bytes=vmem_limit_bytes,
    )

    if add_bias:
        kernel = _linear_bias_kernel
        in_specs = [x_spec, w_spec, pl.BlockSpec((1, tn), lambda i, j, k: (0, j))]
        args = (x_c, w_kn, b_row)
    else:
        kernel = _linear_nobias_kernel
        in_specs = [x_spec, w_spec]
        args = (x_c, w_kn)

    out = pl.pallas_call(
        kernel,
        out_shape=jax.ShapeDtypeStruct((Mp, Np), out_dtype),
        grid_spec=pltpu.PrefetchScalarGridSpec(
            num_scalar_prefetch=0,
            grid=grid,
            in_specs=in_specs,
            out_specs=o_spec,
            scratch_shapes=[pltpu.VMEM((tm, tn), jnp.float32)],
        ),
        compiler_params=params,
        cost_estimate=cost,
    )(*args)

    if (Mp, Np) != (M, n_out):
        out = out[:M, :n_out]
    return out


# ------------------------------- module --------------------------------------


class ColumnParallelLinearPallas:
    """JAX/Pallas port of ColumnParallelLinear forward (world_size == 1)."""

    def __init__(self, input_size, output_size, *, bias=True, skip_bias_add=False,
                 gather_output=False, params_dtype=jnp.float32, key=None):
        self.input_size = input_size
        self.output_size = output_size
        # world_size == 1 -> output_size_per_partition == output_size
        self.output_size_per_partition = output_size
        self.skip_bias_add = skip_bias_add
        self.gather_output = gather_output  # identity at world_size == 1

        if key is None:
            key = jax.random.PRNGKey(0)
        # init_method ~ scaled normal init of the master weight; deterministic here.
        self.weight = (0.02 * jax.random.normal(
            key, (self.output_size_per_partition, self.input_size), jnp.float32)
        ).astype(params_dtype)
        # Module zero-initializes the bias.
        self.bias = (jnp.zeros((self.output_size_per_partition,), params_dtype)
                     if bias else None)

        # ---- chip-aware tiling, decided once per layer (K, N are static) ----
        self._prof = _chip_profile()
        w_bytes = (2 if self.weight.dtype == jnp.float32
                   else jnp.dtype(self.weight.dtype).itemsize)
        self._tm_cap, self._tn, self._tk = _choose_col_tiles(
            self.output_size_per_partition, self.input_size, self._prof,
            x_bytes=2, w_bytes=w_bytes, o_bytes=4)
        self._Kp = _round_up(self.input_size, self._tk)
        self._Np = _round_up(self.output_size_per_partition, self._tn)

        # ---- one-time weight / bias preparation (hoisted out of forward) ----
        # bf16 [K, N] padded to (Kp, Np): canonical (tm,tk)x(tk,tn) MXU
        # contraction, no per-call cast / transpose / pad HBM traffic.
        self._w_kn = self._prep_weight(self.weight)
        self._b_row = None
        if self.bias is not None:
            b = self.bias.astype(jnp.float32)
            if self._Np != self.output_size_per_partition:
                b = jnp.pad(b, (0, self._Np - self.output_size_per_partition))
            self._b_row = b.reshape(1, self._Np)

    def _prep_weight(self, weight):
        N, K = weight.shape
        w = weight.astype(jnp.bfloat16) if weight.dtype == jnp.float32 else weight
        w = w.T  # [K, N]
        if (self._Kp, self._Np) != (K, N):
            w = jnp.pad(w, ((0, self._Kp - K), (0, self._Np - N)))
        return w

    def __call__(self, input_, weight=None):
        # input_: [sequence, batch, hidden]
        S, B, H = input_.shape
        assert H == self.input_size
        N = self.output_size_per_partition

        if weight is None:
            w_kn = self._w_kn
        else:
            # Fallback path (skip_weight_param_allocation): per-call weight is
            # prepared on the fly — costs one extra HBM pass over the weight;
            # prefer construction-time weights.
            assert weight.shape == (N, self.input_size)
            w_kn = self._prep_weight(weight)

        add_bias = (self.bias is not None) and (not self.skip_bias_add)

        x2d = input_.reshape(S * B, H)
        M = S * B
        tm = _choose_tm(M, self._tm_cap, self._prof["num_tc"],
                        self._Np // self._tn)

        out2d = _column_linear_2d(
            x2d, w_kn, self._b_row if add_bias else None,
            tm=tm, tn=self._tn, tk=self._tk, n_out=N,
            add_bias=add_bias, vmem_limit_bytes=self._prof["vmem_limit"])

        output = out2d.reshape(S, B, N)
        output_bias = self.bias if self.skip_bias_add else None
        return output, output_bias


if __name__ == "__main__":
    key = jax.random.PRNGKey(0)
    k_in, k_w = jax.random.split(key)

    # Small, deliberately non-128-multiple shapes to exercise the padding path.
    seq, batch, hidden, out_features = 6, 2, 192, 320

    layer = ColumnParallelLinearPallas(
        hidden, out_features, bias=True, skip_bias_add=False, key=k_w)
    x = jax.random.normal(k_in, (seq, batch, hidden), jnp.float32)

    output, output_bias = layer(x)
    output = jax.block_until_ready(output)

    # Reference with the same bf16 operand rounding + f32 accumulation.
    x_ref = x.astype(jnp.bfloat16).astype(jnp.float32)
    w_ref = layer.weight.astype(jnp.bfloat16).astype(jnp.float32)
    ref = jnp.einsum("sbh,oh->sbo", x_ref, w_ref,
                     precision=jax.lax.Precision.HIGHEST) + layer.bias
    assert output.shape == (seq, batch, out_features)
    assert output_bias is None
    assert jnp.allclose(output, ref, atol=1e-3, rtol=1e-3), float(
        jnp.max(jnp.abs(output - ref)))

    # skip_bias_add path: bias is returned, not added (no bias stream in-kernel).
    layer2 = ColumnParallelLinearPallas(
        hidden, out_features, bias=True, skip_bias_add=True, key=k_w)
    out2, bias2 = layer2(x)
    out2 = jax.block_until_ready(out2)
    ref2 = jnp.einsum("sbh,oh->sbo", x_ref, w_ref,
                      precision=jax.lax.Precision.HIGHEST)
    assert bias2 is not None and bias2.shape == (out_features,)
    assert jnp.allclose(out2, ref2, atol=1e-3, rtol=1e-3)

    print("KERNEL_OK")
</pallas_src>

<mosaic_0001>
module attributes {stable_mosaic.version = 11 : i64} {
  func.func @_linear_bias_kernel(%arg0: i32, %arg1: i32, %arg2: i32, %arg3: memref<16x256xbf16, #tpu.memory_space<vmem>>, %arg4: memref<256x384xbf16, #tpu.memory_space<vmem>>, %arg5: memref<1x384xf32, #tpu.memory_space<vmem>>, %arg6: memref<16x384xf32, #tpu.memory_space<vmem>>, %arg7: memref<16x384xf32, #tpu.memory_space<vmem>>) attributes {dimension_semantics = [#tpu.dimension_semantics<parallel>, #tpu.dimension_semantics<parallel>, #tpu.dimension_semantics<arbitrary>], iteration_bounds = array<i64: 1, 1, 1>, scalar_prefetch = 0 : i64, scratch_operands = 1 : i64, tpu.core_type = #tpu.core_type<tc>, window_params = [{transform_indices = @transform_0, window_bounds = array<i64: 16, 256>}, {transform_indices = @transform_1, window_bounds = array<i64: 256, 384>}, {transform_indices = @transform_2, window_bounds = array<i64: 1, 384>}, {transform_indices = @transform_3, window_bounds = array<i64: 16, 384>}]} {
    %c0_i32 = arith.constant 0 : i32
    %0 = arith.cmpi eq, %arg2, %c0_i32 : i32
    %1 = arith.extui %0 : i1 to i32
    %c0_i32_0 = arith.constant 0 : i32
    %2 = arith.cmpi ne, %1, %c0_i32_0 : i32
    scf.if %2 {
      %cst_10 = arith.constant 0.000000e+00 : f32
      %12 = vector.broadcast %cst_10 : f32 to vector<16x384xf32>
      %c0_11 = arith.constant 0 : index
      %c0_12 = arith.constant 0 : index
      %13 = vector.load %arg7[%c0_11, %c0_12] : memref<16x384xf32, #tpu.memory_space<vmem>>, vector<16x384xf32>
      tpu.vector_store %arg7[%c0_11, %c0_12], %12 {strides = array<i32>} : memref<16x384xf32, #tpu.memory_space<vmem>>, vector<16x384xf32>,
    } else {
    }
    %c0 = arith.constant 0 : index
    %c0_1 = arith.constant 0 : index
    %3 = vector.load %arg7[%c0, %c0_1] : memref<16x384xf32, #tpu.memory_space<vmem>>, vector<16x384xf32>
    %c0_2 = arith.constant 0 : index
    %c0_3 = arith.constant 0 : index
    %4 = vector.load %arg3[%c0_2, %c0_3] : memref<16x256xbf16, #tpu.memory_space<vmem>>, vector<16x256xbf16>
    %c0_4 = arith.constant 0 : index
    %c0_5 = arith.constant 0 : index
    %5 = vector.load %arg4[%c0_4, %c0_5] : memref<256x384xbf16, #tpu.memory_space<vmem>>, vector<256x384xbf16>
    %cst = arith.constant dense<0.000000e+00> : vector<16x384xf32>
    %6 = tpu.matmul %4, %5, %cst {dimension_numbers = #tpu.dot_dimension_numbers<[1], [0], [0], [1], [0, 0, 1, 1], [], []>} : vector<16x256xbf16>, vector<256x384xbf16>, vector<16x384xf32> -> vector<16x384xf32>
    %7 = arith.addf %3, %6 : vector<16x384xf32>
    %c0_6 = arith.constant 0 : index
    %c0_7 = arith.constant 0 : index
    %8 = vector.load %arg7[%c0_6, %c0_7] : memref<16x384xf32, #tpu.memory_space<vmem>>, vector<16x384xf32>
    tpu.vector_store %arg7[%c0_6, %c0_7], %7 {strides = array<i32>} : memref<16x384xf32, #tpu.memory_space<vmem>>, vector<16x384xf32>,
    %c0_i32_8 = arith.constant 0 : i32
    %9 = arith.cmpi eq, %arg2, %c0_i32_8 : i32
    %10 = arith.extui %9 : i1 to i32
    %c0_i32_9 = arith.constant 0 : i32
    %11 = arith.cmpi ne, %10, %c0_i32_9 : i32
    scf.if %11 {
      %c0_10 = arith.constant 0 : index
      %c0_11 = arith.constant 0 : index
      %12 = vector.load %arg7[%c0_10, %c0_11] : memref<16x384xf32, #tpu.memory_space<vmem>>, vector<16x384xf32>
      %c0_12 = arith.constant 0 : index
      %c0_13 = arith.constant 0 : index
      %13 = vector.load %arg5[%c0_12, %c0_13] : memref<1x384xf32, #tpu.memory_space<vmem>>, vector<1x384xf32>
      %14 = vector.broadcast %13 : vector<1x384xf32> to vector<16x384xf32>
      %15 = arith.addf %12, %14 : vector<16x384xf32>
      %c0_14 = arith.constant 0 : index
      %c0_15 = arith.constant 0 : index
      %16 = vector.load %arg6[%c0_14, %c0_15] : memref<16x384xf32, #tpu.memory_space<vmem>>, vector<16x384xf32>
      tpu.vector_store %arg6[%c0_14, %c0_15], %15 {strides = array<i32>} : memref<16x384xf32, #tpu.memory_space<vmem>>, vector<16x384xf32>,
    } else {
    }
    return
  }
  func.func @transform_0(%arg0: i32, %arg1: i32, %arg2: i32) -> (i32, i32) {
    %c0_i32 = arith.constant 0 : i32
    return %arg0, %arg2 : i32, i32
  }
  func.func @transform_1(%arg0: i32, %arg1: i32, %arg2: i32) -> (i32, i32) {
    %c0_i32 = arith.constant 0 : i32
    return %arg2, %arg1 : i32, i32
  }
  func.func @transform_2(%arg0: i32, %arg1: i32, %arg2: i32) -> (i32, i32) {
    %c0_i32 = arith.constant 0 : i32
    %c0_i32_0 = arith.constant 0 : i32
    return %c0_i32, %arg1 : i32, i32
  }
  func.func @transform_3(%arg0: i32, %arg1: i32, %arg2: i32) -> (i32, i32) {
    %c0_i32 = arith.constant 0 : i32
    return %arg0, %arg1 : i32, i32
  }
}

</mosaic_0001>

<bundles_post_ra>
// kernel: _column_linear_2d.1
= control target key start
LH: loop header
LB: loop body
LE: loop exit
PB: predicated region body
PF: predicated region fallthrough
CT: control target
= control target key end

     0   :  { %8 = vsyncpa [#allocation4], 0  ;;  %s876_s0 = inlined_call_operand.hbm [shape: bf16[16,256], index: 0, kind: input, shape index: {}]   ;;  %s877_s1 = inlined_call_operand.hbm [shape: bf16[256,384], index: 1, kind: input, shape index: {}]   ;;  %s878_s2 = inlined_call_operand.hbm [shape: f32[1,384], index: 2, kind: input, shape index: {}]   ;;  %s879_s3 = inlined_call_operand.hbm [shape: f32[16,384], index: 3, kind: output, shape index: {}]  }
   0x1   :  { %9 = vsyncpa [#allocation7], 0 }
   0x2   :  { %10 = vsyncpa [#allocation5], 0  ;;  %s798_s12 = smov [#allocation6]   ;;  %s704_s16 = scalar_lea.hbm %s877_s1, 6144 }
   0x3   :  { %s28_s13 = sshll.u32 %s798_s12, 4  ;;  %p705_p0 = scmp.ne.s32.totalorder %s877_s1, %s704_s16  ;;  %s29_s13 = int_to_ptr.vmem [resolvable:$true] %s28_s13 }
   0x4   :  { %p708_p1 = scmp.lt.u32.totalorder %s704_s16, %s877_s1 }
   0x6   :  { %p710_p2 = pnand %p708_p1, %p705_p0 }
   0x8   :  { %713 = shalt.err (!%p710_p2)
}
   0x9   :  { %s714_s21 = scalar_lea.vmem %s29_s13, 6144  ;;  %p719_p4 = scmp.lt.s32.totalorder %s29_s13, %s29_s13 }
   0xa   :  { %p715_p3 = scmp.ne.s32.totalorder %s29_s13, %s714_s21  ;;  %p720_p5 = scmp.lt.s32.totalorder %s714_s21, %s714_s21 }
   0xc   :  { %p721_p6 = por %p720_p5, %p719_p4 }
   0xe   :  { %p722_p7 = pnand %p721_p6, %p715_p3 }
  0x10   :  { %725 = shalt.err (!%p722_p7)
}
  0x11   :  { %s799_s22 = smov 192   ;;  %s800_s23 = smov 12  }
  0x12   :  { %34 = dma.hbm_to_vmem [thread:$0]  %s877_s1, 6144, %s29_s13, [#allocation7], %s799_s22, %s799_s22, %s800_s23  }
  0x13   :  { %s801_s26 = smov [#allocation3]   ;;  %s726_s30 = scalar_lea.hbm %s876_s0, 256 }
  0x14   :  { %s16_s27 = sshll.u32 %s801_s26, 4  ;;  %p727_p8 = scmp.ne.s32.totalorder %s876_s0, %s726_s30  ;;  %s17_s27 = int_to_ptr.vmem [resolvable:$true] %s16_s27 }
  0x15   :  { %p730_p9 = scmp.lt.u32.totalorder %s726_s30, %s876_s0 }
  0x17   :  { %p732_p10 = pnand %p730_p9, %p727_p8 }
  0x19   :  { %735 = shalt.err (!%p732_p10)
}
  0x1a   :  { %s736_s8 = scalar_lea.vmem %s17_s27, 256  ;;  %p741_p12 = scmp.lt.s32.totalorder %s17_s27, %s17_s27 }
  0x1b   :  { %p737_p11 = scmp.ne.s32.totalorder %s17_s27, %s736_s8  ;;  %p742_p13 = scmp.lt.s32.totalorder %s736_s8, %s736_s8 }
  0x1d   :  { %p743_p0 = por %p742_p13, %p741_p12 }
  0x1f   :  { %p744_p1 = pnand %p743_p0, %p737_p11 }
  0x21   :  { %747 = shalt.err (!%p744_p1)
}
  0x22   :  { %s802_s1 = smov 128   ;;  %s803_s9 = smov 8  }
  0x23   :  { %22 = dma.hbm_to_vmem [thread:$0]  %s876_s0, 256, %s17_s27, [#allocation4], %s802_s1, %s802_s1, %s803_s9  }
  0x24   :  { %s804_s12 = smov [#allocation8]   ;;  %s748_s16 = scalar_lea.hbm %s878_s2, 48 }
  0x25   :  { %s41_s13 = sshll.u32 %s804_s12, 4  ;;  %p749_p2 = scmp.ne.s32.totalorder %s878_s2, %s748_s16  ;;  %s42_s13 = int_to_ptr.vmem [resolvable:$true] %s41_s13 }
  0x26   :  { %p752_p3 = scmp.lt.u32.totalorder %s748_s16, %s878_s2 }
  0x28   :  { %p754_p4 = pnand %p752_p3, %p749_p2 }
  0x2a   :  { %757 = shalt.err (!%p754_p4)
}
  0x2b   :  { %s758_s21 = scalar_lea.vmem %s42_s13, 48  ;;  %s762_s0 = scalar_lea.vmem %s42_s13, 64 }
  0x2c   :  { %p759_p5 = scmp.ne.s32.totalorder %s42_s13, %s758_s21  ;;  %p763_p6 = scmp.lt.s32.totalorder %s42_s13, %s42_s13 }
  0x2d   :  { %p764_p7 = scmp.lt.s32.totalorder %s762_s0, %s758_s21 }
  0x2f   :  { %p765_p8 = por %p764_p7, %p763_p6 }
  0x31   :  { %p766_p9 = pnand %p765_p8, %p759_p5 }
  0x33   :  { %769 = shalt.err (!%p766_p9)
}
  0x34   :  { %44 = dma.hbm_to_vmem [thread:$0]  %s878_s2, 48, %s42_s13, [#allocation7]  }
  0x35   :  { %792 = dma.done.wait [#allocation4], 256  }
  0x36   :  { %793 = vsyncadd [#allocation4], 4294967040 }
  0x37   :  { %794 = dma.done.wait [#allocation7], 6192  }
  0x38   :  { %795 = vsyncadd [#allocation7], 4294961104  ;;  %v637_v0 = vld [vmem:[#allocation6 + $0x4] ss:$12 sps:$4 sm:$0xff]   ;;  %v639_v1 = vld [vmem:[#allocation6] ss:$12 sps:$4 sm:$0xff]   ;;  %v510_v50 = vlaneseq }
  0x39   :  { %403 = vmatprep.subr.bf16.mxu0 %v637_v0  ;;  %v640_v2 = vld [vmem:[#allocation6 + $0x1c] ss:$12 sps:$4 sm:$0xff]   ;;  %v642_v3 = vld [vmem:[#allocation6 + $0x18] ss:$12 sps:$4 sm:$0xff]   ;;  %v643_v4 = vld [vmem:[#allocation6 + $0x34] ss:$12 sps:$4 sm:$0xff]  }
  0x3a   :  { %404 = vmatpush1.bf16.msra.mxu0 %v639_v1  ;;  %v645_v5 = vld [vmem:[#allocation6 + $0x30] ss:$12 sps:$4 sm:$0xff]   ;;  %v646_v6 = vld [vmem:[#allocation6 + $0x4c] ss:$12 sps:$4 sm:$0xff]   ;;  %v658_v7 = vld [vmem:[#allocation6 + $0xc8] ss:$12 sps:$4 sm:$0xff]  }
  0x3b   :  { %405 = vmatprep.subr.bf16.mxu0 %v640_v2  ;;  %v648_v8 = vld [vmem:[#allocation6 + $0x48] ss:$12 sps:$4 sm:$0xff]   ;;  %v649_v9 = vld [vmem:[#allocation6 + $0x64] ss:$12 sps:$4 sm:$0xff]   ;;  %605 = vmatprep.subr.bf16.mxu1 %v658_v7  ;;  %v663_v11 = vld [vmem:[#allocation6 + $0xe0] ss:$12 sps:$4 sm:$0xff]  }
  0x3c   :  { %v661_v10 = vld [vmem:[#allocation6 + $0x8] ss:$12 sps:$4 sm:$0xff]   ;;  %v651_v12 = vld [vmem:[#allocation6 + $0x60] ss:$12 sps:$4 sm:$0xff]   ;;  %v668_v15 = vld [vmem:[#allocation6 + $0xf8] ss:$12 sps:$4 sm:$0xff]  }
  0x3d   :  { %606 = vmatpush3.bf16.msra.mxu1 %v661_v10  ;;  %v652_v13 = vld [vmem:[#allocation6 + $0x7c] ss:$12 sps:$4 sm:$0xff]   ;;  %v666_v14 = vld [vmem:[#allocation6 + $0x20] ss:$12 sps:$4 sm:$0xff]   ;;  %v654_v16 = vld [vmem:[#allocation6 + $0x78] ss:$12 sps:$4 sm:$0xff]  }
  0x3e   :  { %406 = vmatpush1.bf16.msra.mxu0 %v642_v3  ;;  %607 = vmatprep.subr.bf16.mxu1 %v663_v11  ;;  %v671_v17 = vld [vmem:[#allocation6 + $0x38] ss:$12 sps:$4 sm:$0xff]   ;;  %v655_v18 = vld [vmem:[#allocation6 + $0x94] ss:$12 sps:$4 sm:$0xff]   ;;  %v673_v19 = vld [vmem:[#allocation6 + $0x110] ss:$12 sps:$4 sm:$0xff]  }
  0x3f   :  { %407 = vmatprep.subr.bf16.mxu0 %v643_v4  ;;  %v657_v20 = vld [vmem:[#allocation6 + $0x90] ss:$12 sps:$4 sm:$0xff]   ;;  %v678_v22 = vld [vmem:[#allocation6 + $0x128] ss:$12 sps:$4 sm:$0xff]   ;;  %v659_v23 = vld [vmem:[#allocation6 + $0xac] ss:$12 sps:$4 sm:$0xff]  }
  0x40   :  { %v676_v21 = vld [vmem:[#allocation6 + $0x50] ss:$12 sps:$4 sm:$0xff]   ;;  %v662_v24 = vld [vmem:[#allocation6 + $0xa8] ss:$12 sps:$4 sm:$0xff]   ;;  %v683_v26 = vld [vmem:[#allocation6 + $0x140] ss:$12 sps:$4 sm:$0xff]  }
  0x41   :  { %608 = vmatpush3.bf16.msra.mxu1 %v666_v14  ;;  %v681_v25 = vld [vmem:[#allocation6 + $0x68] ss:$12 sps:$4 sm:$0xff]   ;;  %v664_v27 = vld [vmem:[#allocation6 + $0xc4] ss:$12 sps:$4 sm:$0xff]   ;;  %v667_v28 = vld [vmem:[#allocation6 + $0xc0] ss:$12 sps:$4 sm:$0xff]  }
  0x42   :  { %408 = vmatpush1.bf16.msra.mxu0 %v645_v5  ;;  %609 = vmatprep.subr.bf16.mxu1 %v668_v15  ;;  %v686_v29 = vld [vmem:[#allocation6 + $0x80] ss:$12 sps:$4 sm:$0xff]   ;;  %v688_v30 = vld [vmem:[#allocation6 + $0x158] ss:$12 sps:$4 sm:$0xff]   ;;  %v669_v31 = vld [vmem:[#allocation6 + $0xdc] ss:$12 sps:$4 sm:$0xff]  }
  0x43   :  { %409 = vmatprep.subr.bf16.mxu0 %v646_v6  ;;  %v691_v32 = vld [vmem:[#allocation6 + $0x98] ss:$12 sps:$4 sm:$0xff]   ;;  %v693_v34 = vld [vmem:[#allocation6 + $0x170] ss:$12 sps:$4 sm:$0xff]   ;;  %v674_v35 = vld [vmem:[#allocation6 + $0xf4] ss:$12 sps:$4 sm:$0xff]  }
  0x44   :  { %v672_v33 = vld [vmem:[#allocation6 + $0xd8] ss:$12 sps:$4 sm:$0xff]   ;;  %v700_v36 = vld [vmem:[#allocation3 + $0x4] ss:$8 sps:$4 sm:$0xff]   ;;  %v687_v43 = vld [vmem:[#allocation6 + $0x120] ss:$12 sps:$4 sm:$0xff]  }
  0x45   :  { %610 = vmatpush3.bf16.msra.mxu1 %v671_v17  ;;  %v696_v37 = vld [vmem:[#allocation6 + $0xb0] ss:$12 sps:$4 sm:$0xff]   ;;  %v679_v39 = vld [vmem:[#allocation6 + $0x10c] ss:$12 sps:$4 sm:$0xff]   ;;  %478 = vmatprep.mubr.bf16.mxu1 %v700_v36  ;;  %v682_v41 = vld [vmem:[#allocation6 + $0x108] ss:$12 sps:$4 sm:$0xff]  }
  0x46   :  { %410 = vmatpush1.bf16.msra.mxu0 %v648_v8  ;;  %611 = vmatprep.subr.bf16.mxu1 %v673_v19  ;;  %v677_v38 = vld [vmem:[#allocation6 + $0xf0] ss:$12 sps:$4 sm:$0xff]   ;;  %v692_v45 = vld [vmem:[#allocation6 + $0x138] ss:$12 sps:$4 sm:$0xff]   ;;  %v694_v46 = vld [vmem:[#allocation6 + $0x154] ss:$12 sps:$4 sm:$0xff]  }
  0x47   :  { %411 = vmatprep.subr.bf16.mxu0 %v649_v9  ;;  %v698_v40 = vld [vmem:[#allocation3] ss:$8 sps:$4 sm:$0xff]   ;;  %435 = vmatprep.mubr.bf16.mxu0 %v700_v36  ;;  %v689_v44 = vld [vmem:[#allocation6 + $0x13c] ss:$12 sps:$4 sm:$0xff]   ;;  %v511_v51 = vshrl.u32 %v510_v50, 7  ;;  %s805_s2 = smov [#allocation9]  }
  0x48   :  { %v684_v42 = vld [vmem:[#allocation6 + $0x124] ss:$12 sps:$4 sm:$0xff]   ;;  %v701_v48 = vld [vmem:[#allocation6 + $0x16c] ss:$12 sps:$4 sm:$0xff]   ;;  %v703_v49 = vld [vmem:[#allocation6 + $0x168] ss:$12 sps:$4 sm:$0xff]  }
  0x49   :  { %612 = vmatpush3.bf16.msra.mxu1 %v676_v21  ;;  %v697_v47 = vld [vmem:[#allocation6 + $0x150] ss:$12 sps:$4 sm:$0xff]   ;;  %v520_v52 = vsub.s32 2, %v511_v51  ;;  %v508_v53 = vld [vmem:[#allocation8] sm:$0x7]  ;;  %v512_v63 = vsub.s32 0, %v511_v51 }
  0x4a   :  { %412 = vmatpush1.bf16.msra.mxu0 %v651_v12  ;;  %613 = vmatprep.subr.bf16.mxu1 %v678_v22  ;;  %v516_v0 = vsub.s32 1, %v511_v51  ;;  %s542_s24 = sshll.u32 %s805_s2, 4  ;;  %s543_s24 = int_to_ptr.vmem [resolvable:$true] %s542_s24 }
  0x4b   :  { %413 = vmatprep.subr.bf16.mxu0 %v652_v13  ;;  %v521_v55 = vrot.slane %v508_v53, %v520_v52  ;;  %v513_v1 = vrot.slane %v508_v53, %v512_v63  ;;  %s770_s25 = scalar_lea.vmem %s543_s24, 768  ;;  %p775_p11 = scmp.lt.s32.totalorder %s543_s24, %s543_s24 }
  0x4c   :  { %v517_v2 = vrot.slane %v508_v53, %v516_v0  ;;  %p771_p10 = scmp.ne.s32.totalorder %s543_s24, %s770_s25  ;;  %p776_p12 = scmp.lt.s32.totalorder %s770_s25, %s770_s25 }
  0x4d   :  { %614 = vmatpush3.bf16.msra.mxu1 %v681_v25 }
  0x4e   :  { %414 = vmatpush1.bf16.msra.mxu0 %v654_v16  ;;  %615 = vmatprep.subr.bf16.mxu1 %v683_v26  ;;  %p777_p13 = por %p776_p12, %p775_p11 }
  0x4f   :  { %415 = vmatprep.subr.bf16.mxu0 %v655_v18 }
  0x50   :  { %p778_p0 = pnand %p777_p13, %p771_p10 }
  0x51   :  { %616 = vmatpush3.bf16.msra.mxu1 %v686_v29 }
  0x52   :  { %416 = vmatpush1.bf16.msra.mxu0 %v657_v20  ;;  %617 = vmatprep.subr.bf16.mxu1 %v688_v30 }
  0x53   :  { %417 = vmatprep.subr.bf16.mxu0 %v659_v23 }
  0x55   :  { %618 = vmatpush3.bf16.msra.mxu1 %v691_v32 }
  0x56   :  { %418 = vmatpush1.bf16.msra.mxu0 %v662_v24  ;;  %619 = vmatprep.subr.bf16.mxu1 %v693_v34 }
  0x57   :  { %419 = vmatprep.subr.bf16.mxu0 %v664_v27 }
  0x59   :  { %620 = vmatpush3.bf16.msra.mxu1 %v696_v37 }
  0x5a   :  { %420 = vmatpush1.bf16.msra.mxu0 %v667_v28 }
  0x5b   :  { %421 = vmatprep.subr.bf16.mxu0 %v669_v31 }
  0x5c   :  { %479 = vmatmul.mubr.bf16.vlgmr.msra.gmra.mrb[0].mxu1 %v698_v40 }
  0x5e   :  { %422 = vmatpush1.bf16.msra.mxu0 %v672_v33 }
  0x5f   :  { %423 = vmatprep.subr.bf16.mxu0 %v674_v35 }
  0x62   :  { %424 = vmatpush1.bf16.msra.mxu0 %v677_v38 }
  0x63   :  { %425 = vmatprep.subr.bf16.mxu0 %v679_v39 }
  0x66   :  { %426 = vmatpush1.bf16.msra.mxu0 %v682_v41 }
  0x67   :  { %427 = vmatprep.subr.bf16.mxu0 %v684_v42 }
  0x6a   :  { %428 = vmatpush1.bf16.msra.mxu0 %v687_v43 }
  0x6b   :  { %429 = vmatprep.subr.bf16.mxu0 %v689_v44 }
  0x6e   :  { %430 = vmatpush1.bf16.msra.mxu0 %v692_v45 }
  0x6f   :  { %431 = vmatprep.subr.bf16.mxu0 %v694_v46 }
  0x72   :  { %432 = vmatpush1.bf16.msra.mxu0 %v697_v47 }
  0x73   :  { %433 = vmatprep.subr.bf16.mxu0 %v701_v48 }
  0x76   :  { %434 = vmatpush1.bf16.msra.mxu0 %v703_v49 }
  0x79   :  { %436 = vmatmul.mubr.bf16.vlgmr.msra.gmra.mrb[0].mxu0 %v698_v40 }
 0x12f   :  { %v621_v54 = vpop.f32.mrb[0].mxu1 }
 0x130   :  { %v622_v56 = vpop.f32.mrb[1].mxu1 }
 0x131   :  { %v623_v57 = vadd.f32 %v622_v56, %v621_v54  ;;  %v624_v58 = vpop.f32.mrb[2].mxu1 }
 0x132   :  { %v625_v59 = vpop.f32.mrb[3].mxu1 }
 0x133   :  { %v527_v60 = vadd.f32 %v623_v57, %v521_v55  ;;  %v626_v61 = vadd.f32 %v625_v59, %v624_v58 }
 0x135   :  { %533 = vst [vmem:[#allocation9 + $0x10] sm:$0xff] %v527_v60  ;;  %v530_v62 = vadd.f32 %v626_v61, %v521_v55 }
 0x137   :  { %536 = vst [vmem:[#allocation9 + $0x28] sm:$0xff] %v530_v62 }
 0x14c   :  { %v437_v3 = vpop.f32.mrb[0].mxu0 }
 0x14d   :  { %v525_v4 = vadd.f32 %v513_v1, %v437_v3  ;;  %v439_v5 = vpop.f32.mrb[1].mxu0 }
 0x14e   :  { %v526_v6 = vadd.f32 %v517_v2, %v439_v5  ;;  %v441_v7 = vpop.f32.mrb[2].mxu0 }
 0x14f   :  { %531 = vst [vmem:[#allocation9] sm:$0xff] %v525_v4  ;;  %v528_v8 = vadd.f32 %v513_v1, %v441_v7  ;;  %v443_v9 = vpop.f32.mrb[3].mxu0 }
 0x150   :  { %532 = vst [vmem:[#allocation9 + $0x8] sm:$0xff] %v526_v6  ;;  %v529_v10 = vadd.f32 %v517_v2, %v443_v9 }
 0x151   :  { %534 = vst [vmem:[#allocation9 + $0x18] sm:$0xff] %v528_v8 }
 0x152   :  { %535 = vst [vmem:[#allocation9 + $0x20] sm:$0xff] %v529_v10 }
 0x153   :  { %781 = shalt.err (!%p778_p0)
}
 0x154   :  { %s782_s28 = scalar_lea.hbm %s879_s3, 768 }
 0x155   :  { %p783_p1 = scmp.ne.s32.totalorder %s879_s3, %s782_s28  ;;  %p786_p2 = scmp.lt.u32.totalorder %s782_s28, %s879_s3 }
 0x157   :  { %p788_p3 = pnand %p786_p2, %p783_p1 }
 0x159   :  { %791 = shalt.err (!%p788_p3)
}
 0x15a   :  { %s806_s6 = smov 384   ;;  %s807_s7 = smov 24  }
 0x15b   :  { %548 = dma.vmem_to_hbm [thread:$0]  %s543_s24, 768, %s879_s3, [#allocation5], %s806_s6, %s806_s6, %s807_s7  }
 0x15c   :  { %796 = dma.done.wait [#allocation5], 768  }
 0x15d   :  { %797 = vsyncadd [#allocation5], 4294966528 }
 0x15e   :  { %552 = vsyncpa [#allocation4], 1 }
 0x15f   :  { %553 = vsyncpa [#allocation7], 1 }
 0x160   :  { %554 = vsyncpa [#allocation5], 1 }

</bundles_post_ra>
